<compile_context>
chip_gen: v7x
topology: tpu7x:2x2x1
jax: 0.10.0
libtpu: 0.0.40
codegen_flags: <defaults>
</compile_context>

<pallas_src>
import jax
import jax.numpy as jnp
from jax.experimental import pallas as pl
from jax.experimental.pallas import tpu as pltpu


def _round_up(n, m):
    return -(-n // m) * m


def _tiling(batch, tile_cap):
    """Pick (tile_b, padded_batch, n_tiles): tiles are multiples of 8 sublanes."""
    tile_cap = max(8, _round_up(tile_cap, 8))
    b = _round_up(batch, 8)
    n = max(1, -(-b // tile_cap))
    # v7x: keep >=2 grid steps for large batches so the parallel grid axis can be
    # sharded across the two TensorCores (no effect on single-TC v5e/v6e).
    if n == 1 and b >= 2048:
        n = 2
    tb = _round_up(-(-b // n), 8)
    return tb, n * tb, n


def mlp_kernel(x_ref, w1_ref, b1_ref, w2_ref, b2_ref, w3_ref, b3_ref, o_ref):
    cdt = w1_ref.dtype                                   # matmul operand dtype (bf16/f32)
    x = x_ref[...].astype(cdt)                           # (tb, in_dim), cast in-kernel
    # fc1 + relu : (tb, in_dim) @ (in_dim, 64) -> (tb, 64), f32 accumulation.
    h1 = jnp.dot(x, w1_ref[...], preferred_element_type=jnp.float32)
    h1 = jnp.maximum(h1 + b1_ref[...], 0.0)
    # fc2 + relu : (tb, 64) @ (64, 64) -> (tb, 64).
    h2 = jnp.dot(h1.astype(cdt), w2_ref[...], preferred_element_type=jnp.float32)
    h2 = jnp.maximum(h2 + b2_ref[...], 0.0)
    # fc3 matvec on the MXU : (tb, 64) @ (64, 1) -> (tb, 1); scalar bias from SMEM.
    y = jnp.dot(h2.astype(cdt), w3_ref[...], preferred_element_type=jnp.float32)
    o_ref[...] = (y + b3_ref[0]).astype(o_ref.dtype)


def prepare_params(params, compute_dtype=jnp.bfloat16):
    """One-time prep of PyTorch-layout params ((out,in) weights) for the kernel."""
    return {
        "w1t": jnp.asarray(params["w1"], compute_dtype).T,           # (in_dim, 64)
        "b1r": jnp.asarray(params["b1"], jnp.float32).reshape(1, -1),  # (1, 64)
        "w2t": jnp.asarray(params["w2"], compute_dtype).T,           # (64, 64)
        "b2r": jnp.asarray(params["b2"], jnp.float32).reshape(1, -1),  # (1, 64)
        "w3c": jnp.asarray(params["w3"], compute_dtype).T,           # (64, 1)
        "b3": jnp.asarray(params["b3"], jnp.float32).reshape(1),     # (1,) scalar
    }


def net_forward(x, prepped, *, tile_b=8192):
    """x: (B, in_dim) float32; prepped: output of prepare_params. Returns (B, 1) f32."""
    B, in_dim = x.shape
    H = prepped["w2t"].shape[0]
    tb, b_pad, n_tiles = _tiling(B, tile_b)

    # Only pad the batch if it is not already a multiple of the tile (cheap / skipped
    # in the common case); padded rows produce relu(b)-derived garbage and are sliced off.
    x_in = x if b_pad == B else jnp.pad(x, ((0, b_pad - B), (0, 0)))

    const = lambda shape: pl.BlockSpec(shape, lambda i: (0, 0))  # VMEM-resident weights

    out = pl.pallas_call(
        mlp_kernel,
        out_shape=jax.ShapeDtypeStruct((b_pad, 1), jnp.float32),
        grid=(n_tiles,),
        in_specs=[
            pl.BlockSpec((tb, in_dim), lambda i: (i, 0)),        # x batch tile (native)
            const((in_dim, H)),                                  # W1^T
            const((1, H)),                                       # b1 row
            const((H, H)),                                       # W2^T
            const((1, H)),                                       # b2 row
            const((H, 1)),                                       # w3 column
            pl.BlockSpec(memory_space=pltpu.MemorySpace.SMEM),   # b3 scalar in SMEM
        ],
        out_specs=pl.BlockSpec((tb, 1), lambda i: (i, 0)),
        compiler_params=pltpu.CompilerParams(
            dimension_semantics=("parallel",),
            vmem_limit_bytes=32 * 1024 * 1024,
        ),
    )(x_in, prepped["w1t"], prepped["b1r"], prepped["w2t"],
      prepped["b2r"], prepped["w3c"], prepped["b3"])

    return out if b_pad == B else out[:B]


def xavier_uniform(key, fan_out, fan_in):
    # Matches torch.nn.init.xavier_uniform_ bound: sqrt(6 / (fan_in + fan_out)).
    limit = jnp.sqrt(6.0 / (fan_in + fan_out))
    return jax.random.uniform(key, (fan_out, fan_in), jnp.float32, -limit, limit)


def init_params(seed=0, input_dimension=6):
    k1, k2, k3 = jax.random.split(jax.random.PRNGKey(seed), 3)
    return {
        "w1": xavier_uniform(k1, 64, input_dimension),
        "b1": jnp.zeros((64,), jnp.float32),
        "w2": xavier_uniform(k2, 64, 64),
        "b2": jnp.zeros((64,), jnp.float32),
        "w3": xavier_uniform(k3, 1, 64),
        "b3": jnp.zeros((1,), jnp.float32),
    }


if __name__ == "__main__":
    input_dimension = 6
    batch = 8

    params = init_params(seed=0, input_dimension=input_dimension)
    x = jax.random.normal(jax.random.PRNGKey(0), (batch, input_dimension), jnp.float32)

    # Pure-JAX reference of the same forward pass (PyTorch (out, in) weight layout).
    h1 = jnp.maximum(x @ params["w1"].T + params["b1"], 0.0)
    h2 = jnp.maximum(h1 @ params["w2"].T + params["b2"], 0.0)
    ref = h2 @ params["w3"].T + params["b3"]

    # f32 matmul-operand path (tight tolerance).
    prep_f32 = prepare_params(params, compute_dtype=jnp.float32)
    out_f32 = jax.block_until_ready(net_forward(x, prep_f32))
    assert out_f32.shape == (batch, 1)
    assert jnp.allclose(out_f32, ref, atol=1e-4), "f32 kernel mismatch vs reference"

    # Default bf16 matmul-operand path (f32 accumulation, f32 bias/ReLU).
    prep_bf16 = prepare_params(params)  # bfloat16 default
    out_bf16 = jax.block_until_ready(net_forward(x, prep_bf16))
    assert out_bf16.shape == (batch, 1)
    assert float(jnp.max(jnp.abs(out_bf16 - ref))) < 0.1, "bf16 kernel mismatch"

    print("KERNEL_OK")
</pallas_src>

<mosaic_0001>
module attributes {stable_mosaic.version = 11 : i64} {
  func.func @mlp_kernel(%arg0: i32, %arg1: memref<8x6xf32, #tpu.memory_space<vmem>>, %arg2: memref<6x64xf32, #tpu.memory_space<vmem>>, %arg3: memref<1x64xf32, #tpu.memory_space<vmem>>, %arg4: memref<64x64xf32, #tpu.memory_space<vmem>>, %arg5: memref<1x64xf32, #tpu.memory_space<vmem>>, %arg6: memref<64x1xf32, #tpu.memory_space<vmem>>, %arg7: memref<1xf32, #tpu.memory_space<smem>>, %arg8: memref<8x1xf32, #tpu.memory_space<vmem>>) attributes {dimension_semantics = [#tpu.dimension_semantics<parallel>], iteration_bounds = array<i64: 1>, scalar_prefetch = 0 : i64, scratch_operands = 0 : i64, tpu.core_type = #tpu.core_type<tc>, window_params = [{transform_indices = @transform_0, window_bounds = array<i64: 8, 6>}, {pipeline_mode = #tpu.pipeline_mode<synchronous>, transform_indices = @transform_1, window_bounds = array<i64: 6, 64>}, {pipeline_mode = #tpu.pipeline_mode<synchronous>, transform_indices = @transform_2, window_bounds = array<i64: 1, 64>}, {pipeline_mode = #tpu.pipeline_mode<synchronous>, transform_indices = @transform_3, window_bounds = array<i64: 64, 64>}, {pipeline_mode = #tpu.pipeline_mode<synchronous>, transform_indices = @transform_4, window_bounds = array<i64: 1, 64>}, {pipeline_mode = #tpu.pipeline_mode<synchronous>, transform_indices = @transform_5, window_bounds = array<i64: 64, 1>}, {transform_indices = @transform_6, window_bounds = array<i64: 1>}, {transform_indices = @transform_7, window_bounds = array<i64: 8, 1>}]} {
    %c0 = arith.constant 0 : index
    %c0_0 = arith.constant 0 : index
    %0 = vector.load %arg1[%c0, %c0_0] : memref<8x6xf32, #tpu.memory_space<vmem>>, vector<8x6xf32>
    %c0_1 = arith.constant 0 : index
    %c0_2 = arith.constant 0 : index
    %1 = vector.load %arg2[%c0_1, %c0_2] : memref<6x64xf32, #tpu.memory_space<vmem>>, vector<6x64xf32>
    %cst = arith.constant dense<0.000000e+00> : vector<8x64xf32>
    %2 = tpu.matmul %0, %1, %cst {dimension_numbers = #tpu.dot_dimension_numbers<[1], [0], [0], [1], [0, 0, 1, 1], [], []>} : vector<8x6xf32>, vector<6x64xf32>, vector<8x64xf32> -> vector<8x64xf32>
    %c0_3 = arith.constant 0 : index
    %c0_4 = arith.constant 0 : index
    %3 = vector.load %arg3[%c0_3, %c0_4] : memref<1x64xf32, #tpu.memory_space<vmem>>, vector<1x64xf32>
    %4 = vector.broadcast %3 : vector<1x64xf32> to vector<8x64xf32>
    %5 = arith.addf %2, %4 : vector<8x64xf32>
    %cst_5 = arith.constant 0.000000e+00 : f32
    %6 = vector.broadcast %cst_5 : f32 to vector<8x64xf32>
    %7 = arith.maximumf %5, %6 : vector<8x64xf32>
    %c0_6 = arith.constant 0 : index
    %c0_7 = arith.constant 0 : index
    %8 = vector.load %arg4[%c0_6, %c0_7] : memref<64x64xf32, #tpu.memory_space<vmem>>, vector<64x64xf32>
    %cst_8 = arith.constant dense<0.000000e+00> : vector<8x64xf32>
    %9 = tpu.matmul %7, %8, %cst_8 {dimension_numbers = #tpu.dot_dimension_numbers<[1], [0], [0], [1], [0, 0, 1, 1], [], []>} : vector<8x64xf32>, vector<64x64xf32>, vector<8x64xf32> -> vector<8x64xf32>
    %c0_9 = arith.constant 0 : index
    %c0_10 = arith.constant 0 : index
    %10 = vector.load %arg5[%c0_9, %c0_10] : memref<1x64xf32, #tpu.memory_space<vmem>>, vector<1x64xf32>
    %11 = vector.broadcast %10 : vector<1x64xf32> to vector<8x64xf32>
    %12 = arith.addf %9, %11 : vector<8x64xf32>
    %cst_11 = arith.constant 0.000000e+00 : f32
    %13 = vector.broadcast %cst_11 : f32 to vector<8x64xf32>
    %14 = arith.maximumf %12, %13 : vector<8x64xf32>
    %c0_12 = arith.constant 0 : index
    %c0_13 = arith.constant 0 : index
    %15 = vector.load %arg6[%c0_12, %c0_13] : memref<64x1xf32, #tpu.memory_space<vmem>>, vector<64x1xf32>
    %cst_14 = arith.constant dense<0.000000e+00> : vector<8x1xf32>
    %16 = tpu.matmul %14, %15, %cst_14 {dimension_numbers = #tpu.dot_dimension_numbers<[1], [0], [0], [1], [0, 0, 1, 1], [], []>} : vector<8x64xf32>, vector<64x1xf32>, vector<8x1xf32> -> vector<8x1xf32>
    %c0_15 = arith.constant 0 : index
    %17 = memref.load %arg7[%c0_15] : memref<1xf32, #tpu.memory_space<smem>>
    %18 = vector.broadcast %17 : f32 to vector<8x1xf32>
    %19 = arith.addf %16, %18 : vector<8x1xf32>
    %c0_16 = arith.constant 0 : index
    %c0_17 = arith.constant 0 : index
    %20 = vector.load %arg8[%c0_16, %c0_17] : memref<8x1xf32, #tpu.memory_space<vmem>>, vector<8x1xf32>
    tpu.vector_store %arg8[%c0_16, %c0_17], %19 {strides = array<i32>} : memref<8x1xf32, #tpu.memory_space<vmem>>, vector<8x1xf32>,
    return
  }
  func.func @transform_0(%arg0: i32) -> (i32, i32) {
    %c0_i32 = arith.constant 0 : i32
    %c0_i32_0 = arith.constant 0 : i32
    return %arg0, %c0_i32 : i32, i32
  }
  func.func @transform_1(%arg0: i32) -> (i32, i32) {
    %c0_i32 = arith.constant 0 : i32
    %c0_i32_0 = arith.constant 0 : i32
    %c0_i32_1 = arith.constant 0 : i32
    return %c0_i32, %c0_i32_0 : i32, i32
  }
  func.func @transform_2(%arg0: i32) -> (i32, i32) {
    %c0_i32 = arith.constant 0 : i32
    %c0_i32_0 = arith.constant 0 : i32
    %c0_i32_1 = arith.constant 0 : i32
    return %c0_i32, %c0_i32_0 : i32, i32
  }
  func.func @transform_3(%arg0: i32) -> (i32, i32) {
    %c0_i32 = arith.constant 0 : i32
    %c0_i32_0 = arith.constant 0 : i32
    %c0_i32_1 = arith.constant 0 : i32
    return %c0_i32, %c0_i32_0 : i32, i32
  }
  func.func @transform_4(%arg0: i32) -> (i32, i32) {
    %c0_i32 = arith.constant 0 : i32
    %c0_i32_0 = arith.constant 0 : i32
    %c0_i32_1 = arith.constant 0 : i32
    return %c0_i32, %c0_i32_0 : i32, i32
  }
  func.func @transform_5(%arg0: i32) -> (i32, i32) {
    %c0_i32 = arith.constant 0 : i32
    %c0_i32_0 = arith.constant 0 : i32
    %c0_i32_1 = arith.constant 0 : i32
    return %c0_i32, %c0_i32_0 : i32, i32
  }
  func.func @transform_6(%arg0: i32) -> i32 {
    %c0_i32 = arith.constant 0 : i32
    %c0_i32_0 = arith.constant 0 : i32
    return %c0_i32 : i32
  }
  func.func @transform_7(%arg0: i32) -> (i32, i32) {
    %c0_i32 = arith.constant 0 : i32
    %c0_i32_0 = arith.constant 0 : i32
    return %arg0, %c0_i32 : i32, i32
  }
}

</mosaic_0001>

<bundles_post_ra>
// kernel: tpu_custom_call.1
= control target key start
LH: loop header
LB: loop body
LE: loop exit
PB: predicated region body
PF: predicated region fallthrough
CT: control target
= control target key end

     0   :  { %13 = vsyncpa [#allocation4], 0  ;;  %s428_s24 = smov [#allocation3]   ;;  %s550_s0 = inlined_call_operand.vmem [shape: f32[8,6], index: 0, kind: input, shape index: {}]   ;;  %s551_s1 = inlined_call_operand.vmem [shape: f32[6,64], index: 1, kind: input, shape index: {}]   ;;  %s552_s2 = inlined_call_operand.hbm [shape: f32[1,64], index: 2, kind: input, shape index: {}]   ;;  %s553_s3 = inlined_call_operand.vmem [shape: f32[64,64], index: 3, kind: input, shape index: {}]   ;;  %s554_s4 = inlined_call_operand.vmem [shape: f32[1,64], index: 4, kind: input, shape index: {}]   ;;  %s555_s5 = inlined_call_operand.vmem [shape: f32[64,1], index: 5, kind: input, shape index: {}]   ;;  %s556_s6 = inlined_call_operand.<no memory space> [shape: f32[1], index: 6, kind: input, shape index: {}]   ;;  %s557_s7 = inlined_call_operand.vmem [shape: f32[8,1], index: 7, kind: output, shape index: {}]  }
   0x1   :  { %s24_s25 = sshll.u32 %s428_s24, 4  ;;  %s404_s28 = scalar_lea.hbm %s552_s2, 16  ;;  %s25_s25 = int_to_ptr.vmem [resolvable:$true] %s24_s25 }
   0x2   :  { %p405_p0 = scmp.ne.s32.totalorder %s552_s2, %s404_s28  ;;  %p408_p1 = scmp.lt.u32.totalorder %s404_s28, %s552_s2 }
   0x4   :  { %p410_p2 = pnand %p408_p1, %p405_p0 }
   0x6   :  { %413 = shalt.err (!%p410_p2)
}
   0x7   :  { %s414_s10 = scalar_lea.vmem %s25_s25, 16  ;;  %s418_s11 = scalar_lea.vmem %s25_s25, 32 }
   0x8   :  { %p415_p3 = scmp.ne.s32.totalorder %s25_s25, %s414_s10  ;;  %p419_p4 = scmp.lt.s32.totalorder %s25_s25, %s25_s25 }
   0x9   :  { %p420_p5 = scmp.lt.s32.totalorder %s418_s11, %s414_s10 }
   0xb   :  { %p421_p6 = por %p420_p5, %p419_p4 }
   0xd   :  { %p422_p7 = pnand %p421_p6, %p415_p3 }
   0xf   :  { %425 = shalt.err (!%p422_p7)
}
  0x10   :  { %27 = dma.hbm_to_vmem [thread:$0]  %s552_s2, 16, %s25_s25, [#allocation4]  }
  0x11   :  { %426 = dma.done.wait [#allocation4], 16  }
  0x12   :  { %427 = vsyncadd [#allocation4], 4294967280  ;;  %v429_v0 = vmov 0.0   ;;  %vm430_vm0 = vmmov 0   ;;  %v431_v1 = vmov 0.0|0.0   ;;  %vm52_vm1 = vcmask 1045504  }
  0x13   :  { %333 = vmatprep.subr.mxu0 %v429_v0  ;;  %335 = vmatprep.mubr.msk.f32.mxu0 %vm430_vm0, %v429_v0  ;;  %vm48_vm2 = vcmask 48128   ;;  %v40_v2 = vld [vmem:[%s551_s1] sm:$0x3f]  ;;  %v128_v5 = vld [vmem:[%s553_s3 + $0x8] sm:$0xff]  ;;  %v129_v6 = vld [vmem:[%s553_s3 + $0x10] sm:$0xff]  ;;  %vm142_vm3 = vcmask 523264   ;;  %v226_v38 = vstv %s556_s6 }
  0x14   :  { %376 = vmatprep.subr.bf16.mxu1 %v431_v1  ;;  %354 = vmatprep.mubr.msk.f32.mxu1 %vm430_vm0, %v429_v0  ;;  %v39_v3 = vld [vmem:[%s550_s0] sm:$0xff]  ;;  %v130_v7 = vld [vmem:[%s553_s3 + $0x18] sm:$0xff]  ;;  %v132_v11 = vld [vmem:[%s553_s3 + $0x28] sm:$0xff]  ;;  %vm300_vm4 = vcmask 7168  }
  0x15   :  { %v127_v4 = vld [vmem:[%s553_s3] sm:$0xff]  ;;  %334 = vmatpush3.msk.msra.mxu0 %vm52_vm1, %v40_v2  ;;  %v380_v9 = vpack.c.bf16 %v130_v7, %v129_v6  ;;  %v133_v13 = vld [vmem:[%s553_s3 + $0x30] sm:$0xff]  ;;  %v134_v14 = vld [vmem:[%s553_s3 + $0x38] sm:$0xff] }
  0x16   :  { %336 = vmatmul.mubr.msk.f32.vlgmr.msra.gmra.mrb[0].mxu0 %vm48_vm2, %v39_v3  ;;  %v377_v8 = vpack.c.bf16 %v128_v5, %v127_v4  ;;  %388 = vmatprep.subr.bf16.mxu0 %v431_v1  ;;  %v131_v10 = vld [vmem:[%s553_s3 + $0x20] sm:$0xff]  ;;  %v386_v15 = vpack.c.bf16 %v134_v14, %v133_v13  ;;  %v218_v17 = vld [vmem:[%s555_s5 + $0x8] sm:$0xff]  ;;  %v219_v18 = vld [vmem:[%s555_s5 + $0x10] sm:$0xff] }
  0x17   :  { %373 = vmatprep.mubr.msk.f32.mxu0 %vm430_vm0, %v429_v0  ;;  %v383_v12 = vpack.c.bf16 %v132_v11, %v131_v10  ;;  %v217_v16 = vld [vmem:[%s555_s5] sm:$0xff]  ;;  %v220_v20 = vld [vmem:[%s555_s5 + $0x18] sm:$0xff]  ;;  %v222_v23 = vld [vmem:[%s555_s5 + $0x28] sm:$0xff] }
  0x18   :  { %378 = vmatpush3.bf16.msra.mxu1 %v377_v8  ;;  %v389_v19 = vpack.c.bf16 %v218_v17, %v217_v16  ;;  %v392_v21 = vpack.c.bf16 %v220_v20, %v219_v18  ;;  %v221_v22 = vld [vmem:[%s555_s5 + $0x20] sm:$0xff]  ;;  %v223_v30 = vld [vmem:[%s555_s5 + $0x30] sm:$0xff]  ;;  %v224_v31 = vld [vmem:[%s555_s5 + $0x38] sm:$0xff] }
  0x19   :  { %379 = vmatprep.subr.bf16.mxu1 %v431_v1  ;;  %v395_v24 = vpack.c.bf16 %v222_v23, %v221_v22  ;;  %v307_v25 = vld [vmem:[#allocation3] ss:$0 sm:$0xff]  ;;  %v398_v32 = vpack.c.bf16 %v224_v31, %v223_v30 }
  0x1a   :  { %390 = vmatpush3.bf16.msra.mxu0 %v389_v19  ;;  %v310_v33 = vld [vmem:[%s554_s4] ss:$0 sm:$0xff] }
  0x1b   :  { %391 = vmatprep.subr.bf16.mxu0 %v431_v1 }
  0x1c   :  { %381 = vmatpush3.bf16.msra.mxu1 %v380_v9 }
  0x1d   :  { %382 = vmatprep.subr.bf16.mxu1 %v431_v1 }
  0x1e   :  { %393 = vmatpush3.bf16.msra.mxu0 %v392_v21 }
  0x1f   :  { %394 = vmatprep.subr.bf16.mxu0 %v431_v1 }
  0x20   :  { %384 = vmatpush3.bf16.msra.mxu1 %v383_v12 }
  0x21   :  { %385 = vmatprep.subr.bf16.mxu1 %v431_v1 }
  0x22   :  { %396 = vmatpush3.bf16.msra.mxu0 %v395_v24 }
  0x23   :  { %397 = vmatprep.subr.bf16.mxu0 %v431_v1 }
  0x24   :  { %387 = vmatpush3.bf16.msra.mxu1 %v386_v15 }
  0x26   :  { %399 = vmatpush3.bf16.msra.mxu0 %v398_v32 }
  0xe9   :  { %v122_v26 = vpop.f32.mrb[0].mxu0 }
  0xea   :  { %v123_v27 = vadd.f32 %v307_v25, %v122_v26  ;;  %v337_v28 = vpop.f32.mrb[1].mxu0 }
  0xec   :  { %v126_v29 = vmax.f32 %v123_v27, 0.0 }
  0xee   :  { %355 = vmatmul.mubr.msk.f32.vlgmr.msra.gmra.mrb[0].mxu1 %vm142_vm3, %v126_v29 }
 0x1c1   :  { %v212_v34 = vpop.f32.mrb[0].mxu1 }
 0x1c2   :  { %v213_v35 = vadd.f32 %v310_v33, %v212_v34  ;;  %v356_v36 = vpop.f32.mrb[1].mxu1 }
 0x1c4   :  { %v216_v37 = vmax.f32 %v213_v35, 0.0 }
 0x1c6   :  { %374 = vmatmul.mubr.msk.f32.vlgmr.msra.gmra.mrb[2].mxu0 %vm142_vm3, %v216_v37 }
 0x299   :  { %v296_v39 = vpop.f32.mrb[2].mxu0 }
 0x29a   :  { %v297_v40 = vadd.f32 %v296_v39, %v226_v38  ;;  %v375_v41 = vpop.f32.mrb[3].mxu0 }
 0x29c   :  { %301 = vst.msk [vmem:[%s557_s7] sm:$0xff] %vm300_vm4, %v297_v40 }
 0x29d   :  { %306 = vsyncpa [#allocation4], 1 }

</bundles_post_ra>
